<compile_context>
chip_gen: v5e
topology: v5e:2x2
jax: 0.10.0
libtpu: 0.0.40
codegen_flags: <defaults>
</compile_context>

<pallas_src>
import functools

import jax
import jax.numpy as jnp
from jax import lax
from jax.experimental import pallas as pl
from jax.experimental.pallas import tpu as pltpu


def _round_up(n, m):
    return ((n + m - 1) // m) * m


def _refined_recip(x):
    """EUP approximate reciprocal + one Newton-Raphson step (near-f32 accuracy)."""
    r = pl.reciprocal(x, approx=True)
    return r * (2.0 - x * r)


def _clustering_kernel(x_ref, w_ref, wsq_ref, o_ref, *, alpha, k_actual):
    x = x_ref[...]          # (TB, Dp) f32   batch tile
    w = w_ref[...]          # (Kp, Dp) f32   resident cluster centers
    wsq = wsq_ref[...]      # (1, Kp)  f32   precomputed ||w_j||^2 (padded cols = 0)

    # dist[b, j] = ||x_b||^2 + ||w_j||^2 - 2 <x_b, w_j>   -- dominant term on the MXU
    xw = lax.dot_general(
        x, w, (((1,), (1,)), ((), ())), preferred_element_type=jnp.float32
    )                                                       # (TB, Kp)
    xsq = jnp.sum(x * x, axis=-1, keepdims=True)            # (TB, 1)
    dist = jnp.maximum(xsq + wsq - 2.0 * xw, 0.0)           # clamp cancellation

    # Student-t kernel: (1 + d/alpha)^(-(alpha+1)/2)
    if alpha == 1.0:
        # exponent is exactly 1 -> one (refined) reciprocal
        q = _refined_recip(1.0 + dist)
    else:
        q = jnp.exp((-(alpha + 1.0) / 2.0) * jnp.log1p(dist / alpha))

    # Mask out padded cluster columns so they don't pollute the row sum.
    kp = q.shape[-1]
    if k_actual < kp:
        col = lax.broadcasted_iota(jnp.int32, q.shape, 1)
        q = jnp.where(col < k_actual, q, 0.0)

    denom = jnp.sum(q, axis=-1, keepdims=True)               # (TB, 1)
    o_ref[...] = q * _refined_recip(denom)


def clustering_layer(x, weight, alpha=1.0):
    """x: (B, in_features), weight: (out_features, in_features). Returns (B, out_features)."""
    B, D = x.shape
    K, D2 = weight.shape
    assert D == D2

    # Lane/sublane-dense padded shapes.
    Dp = _round_up(D, 128)
    Kp = _round_up(K, 128)
    B8 = _round_up(B, 8)
    TB = min(256, B8)            # batch tile (multiple of 8); resident weight stays full-K
    Bp = _round_up(B8, TB)

    x_p = jnp.zeros((Bp, Dp), jnp.float32).at[:B, :D].set(x.astype(jnp.float32))
    w_p = jnp.zeros((Kp, Dp), jnp.float32).at[:K, :D].set(weight.astype(jnp.float32))
    # Hoisted once: ||w_j||^2 for every (padded) cluster; zero-padding keeps it exact.
    wsq = jnp.sum(w_p * w_p, axis=-1)[None, :]               # (1, Kp)

    kernel = functools.partial(_clustering_kernel, alpha=float(alpha), k_actual=K)

    out_p = pl.pallas_call(
        kernel,
        out_shape=jax.ShapeDtypeStruct((Bp, Kp), jnp.float32),
        grid_spec=pltpu.PrefetchScalarGridSpec(
            num_scalar_prefetch=0,
            grid=(Bp // TB,),
            in_specs=[
                pl.BlockSpec((TB, Dp), lambda i: (i, 0)),    # x tile, pipelined over B
                pl.BlockSpec((Kp, Dp), lambda i: (0, 0)),    # weight, VMEM-resident
                pl.BlockSpec((1, Kp), lambda i: (0, 0)),     # ||w||^2, VMEM-resident
            ],
            out_specs=pl.BlockSpec((TB, Kp), lambda i: (i, 0)),
        ),
        compiler_params=pltpu.CompilerParams(
            dimension_semantics=("parallel",),               # B tiles shard across TCs
        ),
    )(x_p, w_p, wsq)

    return out_p[:B, :K]


def clustering_layer_ref(x, weight, alpha=1.0):
    """Pure-JAX reference mirroring the PyTorch forward (exact-difference form)."""
    diff = x[:, None, :] - weight[None, :, :]
    d = jnp.sum(diff * diff, axis=2)
    q = 1.0 + d / alpha
    q = 1.0 / q
    q = q ** ((alpha + 1.0) / 2.0)
    return q / jnp.sum(q, axis=1, keepdims=True)


def xavier_uniform(key, out_features, in_features):
    # torch.nn.init.xavier_uniform_ with gain=1
    bound = (6.0 / (in_features + out_features)) ** 0.5
    return jax.random.uniform(
        key, (out_features, in_features), dtype=jnp.float32,
        minval=-bound, maxval=bound)


if __name__ == "__main__":
    # Module defaults: in_features=10, out_features=10, alpha=1.0.
    in_features = 10
    out_features = 10
    alpha = 1.0
    batch = 8

    key = jax.random.PRNGKey(0)
    kx, kw = jax.random.split(key)
    x = jax.random.normal(kx, (batch, in_features), dtype=jnp.float32)
    weight = xavier_uniform(kw, out_features, in_features)

    out = clustering_layer(x, weight, alpha=alpha)
    out = jax.block_until_ready(out)

    ref = clustering_layer_ref(x, weight, alpha=alpha)
    assert out.shape == (batch, out_features)
    # Newton-refined reciprocals + matmul-form distance -> tight tolerance.
    assert jnp.allclose(out, ref, atol=1e-3, rtol=1e-3), "mismatch vs reference"
    # Rows normalize to 1 over the real clusters.
    assert jnp.allclose(jnp.sum(out, axis=1), 1.0, atol=1e-3), "rows not normalized"

    print("KERNEL_OK")
</pallas_src>

<mosaic_0001>
module attributes {stable_mosaic.version = 11 : i64} {
  func.func @_clustering_kernel(%arg0: i32, %arg1: memref<8x128xf32, #tpu.memory_space<vmem>>, %arg2: memref<128x128xf32, #tpu.memory_space<vmem>>, %arg3: memref<1x128xf32, #tpu.memory_space<vmem>>, %arg4: memref<8x128xf32, #tpu.memory_space<vmem>>) attributes {dimension_semantics = [#tpu.dimension_semantics<parallel>], iteration_bounds = array<i64: 1>, scalar_prefetch = 0 : i64, scratch_operands = 0 : i64, tpu.core_type = #tpu.core_type<tc>, window_params = [{transform_indices = @transform_0, window_bounds = array<i64: 8, 128>}, {pipeline_mode = #tpu.pipeline_mode<synchronous>, transform_indices = @transform_1, window_bounds = array<i64: 128, 128>}, {pipeline_mode = #tpu.pipeline_mode<synchronous>, transform_indices = @transform_2, window_bounds = array<i64: 1, 128>}, {transform_indices = @transform_3, window_bounds = array<i64: 8, 128>}]} {
    %c0 = arith.constant 0 : index
    %c0_0 = arith.constant 0 : index
    %0 = vector.load %arg1[%c0, %c0_0] : memref<8x128xf32, #tpu.memory_space<vmem>>, vector<8x128xf32>
    %c0_1 = arith.constant 0 : index
    %c0_2 = arith.constant 0 : index
    %1 = vector.load %arg2[%c0_1, %c0_2] : memref<128x128xf32, #tpu.memory_space<vmem>>, vector<128x128xf32>
    %c0_3 = arith.constant 0 : index
    %c0_4 = arith.constant 0 : index
    %2 = vector.load %arg3[%c0_3, %c0_4] : memref<1x128xf32, #tpu.memory_space<vmem>>, vector<1x128xf32>
    %cst = arith.constant dense<0.000000e+00> : vector<8x128xf32>
    %3 = tpu.matmul %0, %1, %cst {dimension_numbers = #tpu.dot_dimension_numbers<[1], [1], [0], [0], [0, 0, 1, 0], [], []>} : vector<8x128xf32>, vector<128x128xf32>, vector<8x128xf32> -> vector<8x128xf32>
    %4 = arith.mulf %0, %0 : vector<8x128xf32>
    %cst_5 = arith.constant dense<0.000000e+00> : vector<8xf32>
    %5 = vector.multi_reduction <add>, %4, %cst_5 [1] : vector<8x128xf32> to vector<8xf32>
    %6 = vector.shape_cast %5 : vector<8xf32> to vector<8x1xf32>
    %7 = vector.broadcast %6 : vector<8x1xf32> to vector<8x128xf32>
    %8 = vector.broadcast %2 : vector<1x128xf32> to vector<8x128xf32>
    %9 = arith.addf %7, %8 : vector<8x128xf32>
    %cst_6 = arith.constant 2.000000e+00 : f32
    %10 = vector.broadcast %cst_6 : f32 to vector<8x128xf32>
    %11 = arith.mulf %10, %3 : vector<8x128xf32>
    %12 = arith.subf %9, %11 : vector<8x128xf32>
    %cst_7 = arith.constant 0.000000e+00 : f32
    %13 = vector.broadcast %cst_7 : f32 to vector<8x128xf32>
    %14 = arith.maximumf %12, %13 : vector<8x128xf32>
    %cst_8 = arith.constant 1.000000e+00 : f32
    %15 = vector.broadcast %cst_8 : f32 to vector<8x128xf32>
    %16 = arith.addf %15, %14 : vector<8x128xf32>
    %17 = tpu.reciprocal %16 {approx = true} : vector<8x128xf32> -> vector<8x128xf32>
    %18 = arith.mulf %16, %17 : vector<8x128xf32>
    %cst_9 = arith.constant 2.000000e+00 : f32
    %19 = vector.broadcast %cst_9 : f32 to vector<8x128xf32>
    %20 = arith.subf %19, %18 : vector<8x128xf32>
    %21 = arith.mulf %17, %20 : vector<8x128xf32>
    %22 = tpu.iota {dimensions = array<i32: 1>} : vector<8x128xi32>
    %c10_i32 = arith.constant 10 : i32
    %23 = vector.broadcast %c10_i32 : i32 to vector<8x128xi32>
    %24 = arith.cmpi slt, %22, %23 : vector<8x128xi32>
    %cst_10 = arith.constant 0.000000e+00 : f32
    %25 = vector.broadcast %cst_10 : f32 to vector<8x128xf32>
    %26 = arith.select %24, %21, %25 : vector<8x128xi1>, vector<8x128xf32>
    %cst_11 = arith.constant dense<0.000000e+00> : vector<8xf32>
    %27 = vector.multi_reduction <add>, %26, %cst_11 [1] : vector<8x128xf32> to vector<8xf32>
    %28 = vector.shape_cast %27 : vector<8xf32> to vector<8x1xf32>
    %29 = tpu.reciprocal %28 {approx = true} : vector<8x1xf32> -> vector<8x1xf32>
    %30 = arith.mulf %28, %29 : vector<8x1xf32>
    %cst_12 = arith.constant 2.000000e+00 : f32
    %31 = vector.broadcast %cst_12 : f32 to vector<8x1xf32>
    %32 = arith.subf %31, %30 : vector<8x1xf32>
    %33 = arith.mulf %29, %32 : vector<8x1xf32>
    %34 = vector.broadcast %33 : vector<8x1xf32> to vector<8x128xf32>
    %35 = arith.mulf %26, %34 : vector<8x128xf32>
    %c0_13 = arith.constant 0 : index
    %c0_14 = arith.constant 0 : index
    %36 = vector.load %arg4[%c0_13, %c0_14] : memref<8x128xf32, #tpu.memory_space<vmem>>, vector<8x128xf32>
    tpu.vector_store %arg4[%c0_13, %c0_14], %35 {strides = array<i32>} : memref<8x128xf32, #tpu.memory_space<vmem>>, vector<8x128xf32>,
    return
  }
  func.func @transform_0(%arg0: i32) -> (i32, i32) {
    %c0_i32 = arith.constant 0 : i32
    %c0_i32_0 = arith.constant 0 : i32
    return %arg0, %c0_i32 : i32, i32
  }
  func.func @transform_1(%arg0: i32) -> (i32, i32) {
    %c0_i32 = arith.constant 0 : i32
    %c0_i32_0 = arith.constant 0 : i32
    %c0_i32_1 = arith.constant 0 : i32
    return %c0_i32, %c0_i32_0 : i32, i32
  }
  func.func @transform_2(%arg0: i32) -> (i32, i32) {
    %c0_i32 = arith.constant 0 : i32
    %c0_i32_0 = arith.constant 0 : i32
    %c0_i32_1 = arith.constant 0 : i32
    return %c0_i32, %c0_i32_0 : i32, i32
  }
  func.func @transform_3(%arg0: i32) -> (i32, i32) {
    %c0_i32 = arith.constant 0 : i32
    %c0_i32_0 = arith.constant 0 : i32
    return %arg0, %c0_i32 : i32, i32
  }
}

</mosaic_0001>

<bundles_post_ra>
// kernel: tpu_custom_call.1
= control target key start
LH: loop header
LB: loop body
LE: loop exit
PB: predicated region body
PF: predicated region fallthrough
CT: control target
= control target key end

     0   :  { %8 = vsyncpa [#allocation3], 0  ;;  %s253_s0 = inlined_call_operand.hbm [shape: f32[8,128], index: 0, kind: input, shape index: {}]   ;;  %s254_s1 = inlined_call_operand.hbm [shape: f32[128,128], index: 1, kind: input, shape index: {}]   ;;  %s255_s2 = inlined_call_operand.vmem [shape: f32[1,128], index: 2, kind: input, shape index: {}]   ;;  %s256_s3 = inlined_call_operand.hbm [shape: f32[8,128], index: 3, kind: output, shape index: {}]  }
   0x1   :  { %9 = vsyncpa [#allocation6], 0 }
   0x2   :  { %10 = vsyncpa [#allocation4], 0  ;;  %s16_s14 = sshll.u32 %s253_s0, 4  ;;  %s216_s15 = smov [#allocation2]   ;;  %s17_s14 = int_to_ptr.hbm [resolvable:$true] %s16_s14 }
   0x3   :  { %s18_s16 = sshll.u32 %s216_s15, 4  ;;  %s26_s19 = sshll.u32 %s254_s1, 4  ;;  %s19_s16 = int_to_ptr.vmem [resolvable:$true] %s18_s16  ;;  %s27_s19 = int_to_ptr.hbm [resolvable:$true] %s26_s19 }
   0x4   :  { %21 = dma.hbm_to_vmem [thread:$0]  %s17_s14, 128, %s19_s16, [#allocation3]  }
   0x5   :  { %s217_s20 = smov [#allocation5]   ;;  %s218_s22 = smov 128  }
   0x6   :  { %s28_s21 = sshll.u32 %s217_s20, 4  ;;  %s219_s23 = smov 8   ;;  %s29_s21 = int_to_ptr.vmem [resolvable:$true] %s28_s21 }
   0x7   :  { %34 = dma.hbm_to_vmem [thread:$0]  %s27_s19, 2048, %s29_s21, [#allocation6], %s218_s22, %s218_s22, %s219_s23  }
   0x8   :  { %210 = dma.done.wait [#allocation3], 128  }
   0x9   :  { %211 = vsyncadd [#allocation3], 4294967168 }
   0xa   :  { %212 = dma.done.wait [#allocation6], 2048  }
   0xb   :  { %213 = vsyncadd [#allocation6], 4294965248  ;;  %v61_v0 = vld [vmem:[#allocation5 + $0x78] sm:$0xff]  ;;  %v60_v1 = vld [vmem:[#allocation5 + $0x70] sm:$0xff]  ;;  %v98_v26 = vlaneseq  ;;  %s117_s27 = sshll.u32 %s256_s3, 4  ;;  %s118_s27 = int_to_ptr.hbm [resolvable:$true] %s117_s27 }
   0xc   :  { %63 = vmatpush.xpose.msra.mxu0 %v61_v0  ;;  %v59_v2 = vld [vmem:[#allocation5 + $0x68] sm:$0xff]  ;;  %v58_v3 = vld [vmem:[#allocation5 + $0x60] sm:$0xff]  ;;  %v57_v4 = vld [vmem:[#allocation5 + $0x58] sm:$0xff] }
   0xd   :  { %v56_v5 = vld [vmem:[#allocation5 + $0x50] sm:$0xff]  ;;  %v55_v6 = vld [vmem:[#allocation5 + $0x48] sm:$0xff]  ;;  %v54_v7 = vld [vmem:[#allocation5 + $0x40] sm:$0xff]  ;;  %v99_v28 = vand.u32 127, %v98_v26 }
   0xe   :  { %v53_v8 = vld [vmem:[#allocation5 + $0x38] sm:$0xff]  ;;  %v52_v11 = vld [vmem:[#allocation5 + $0x30] sm:$0xff]  ;;  %v51_v12 = vld [vmem:[#allocation5 + $0x28] sm:$0xff] }
   0xf   :  { %v45_v9 = vld [vmem:[#allocation2] sm:$0xff]  ;;  %v50_v13 = vld [vmem:[#allocation5 + $0x20] sm:$0xff]  ;;  %v48_v15 = vld [vmem:[#allocation5 + $0x10] sm:$0xff]  ;;  %vm100_vm0 = vcmp.lt.s32.totalorder %v99_v28, 10 }
  0x10   :  { %64 = vmatpush.xpose.msra.mxu0 %v60_v1  ;;  %v83_v10 = vmul.f32 %v45_v9, %v45_v9  ;;  %v49_v14 = vld [vmem:[#allocation5 + $0x18] sm:$0xff]  ;;  %v47_v16 = vld [vmem:[#allocation5 + $0x8] sm:$0xff]  ;;  %v46_v17 = vld [vmem:[#allocation5] sm:$0xff] }
  0x11   :  { %v133_v18 = vld [vmem:[%s255_s2] ss:$0 sm:$0xff]  ;;  %s220_s2 = smov [#allocation7]  }
  0x12   :  { %84 = vadd.xlane.f32.xlu0 %v83_v10  ;;  %s115_s24 = sshll.u32 %s220_s2, 4  ;;  %s116_s24 = int_to_ptr.vmem [resolvable:$true] %s115_s24 }
  0x14   :  { %65 = vmatpush.xpose.msra.mxu0 %v59_v2 }
  0x18   :  { %66 = vmatpush.xpose.msra.mxu0 %v58_v3 }
  0x1c   :  { %67 = vmatpush.xpose.msra.mxu0 %v57_v4 }
  0x20   :  { %68 = vmatpush.xpose.msra.mxu0 %v56_v5 }
  0x24   :  { %69 = vmatpush.xpose.msra.mxu0 %v55_v6 }
  0x28   :  { %70 = vmatpush.xpose.msra.mxu0 %v54_v7 }
  0x2c   :  { %71 = vmatpush.xpose.msra.mxu0 %v53_v8 }
  0x30   :  { %72 = vmatpush.xpose.msra.mxu0 %v52_v11 }
  0x34   :  { %73 = vmatpush.xpose.msra.mxu0 %v51_v12 }
  0x38   :  { %74 = vmatpush.xpose.msra.mxu0 %v50_v13 }
  0x3c   :  { %75 = vmatpush.xpose.msra.mxu0 %v49_v14 }
  0x40   :  { %76 = vmatpush.xpose.msra.mxu0 %v48_v15 }
  0x44   :  { %77 = vmatpush.xpose.msra.mxu0 %v47_v16 }
  0x48   :  { %78 = vmatpush.xpose.msra.mxu0 %v46_v17 }
  0x4b   :  { %79 = vmatmul.f32.vlgmr.msra.gmra.mxu0 %v45_v9 }
  0x85   :  { %v85_v19 = vpop.xlane.xlu0 %84 }
  0x86   :  { %v89_v20 = vadd.f32 %v133_v18, %v85_v19 }
  0xc8   :  { %v80_v21 = vpop.f32.mrf.mxu0 }
  0xc9   :  { %v90_v22 = vmul.f32 2.0, %v80_v21 }
  0xcb   :  { %v91_v23 = vsub.f32 %v89_v20, %v90_v22 }
  0xcd   :  { %v92_v24 = vmax.f32 %v91_v23, 0.0 }
  0xcf   :  { %v93_v25 = vadd.f32 1.0, %v92_v24 }
  0xd1   :  { %134 = vrcp.f32 %v93_v25 }
  0xd7   :  { %v135_v27 = vpop.eup %134 }
  0xd8   :  { %v95_v29 = vmul.f32 %v135_v27, %v93_v25 }
  0xda   :  { %v96_v30 = vsub.f32 2.0, %v95_v29 }
  0xdc   :  { %v97_v31 = vmul.f32 %v135_v27, %v96_v30 }
  0xde   :  { %v101_v32 = vsel %vm100_vm0, %v97_v31, 0.0 }
  0xdf   :  { %102 = vadd.xlane.f32.xlu0 %v101_v32 }
 0x152   :  { %v103_v33 = vpop.xlane.xlu0 %102 }
 0x153   :  { %136 = vrcp.f32 %v103_v33 }
 0x159   :  { %v137_v34 = vpop.eup %136 }
 0x15a   :  { %v105_v35 = vmul.f32 %v137_v34, %v103_v33 }
 0x15c   :  { %v106_v36 = vsub.f32 2.0, %v105_v35 }
 0x15e   :  { %v107_v37 = vmul.f32 %v137_v34, %v106_v36 }
 0x160   :  { %v108_v38 = vmul.f32 %v107_v37, %v101_v32 }
 0x162   :  { %109 = vst [vmem:[#allocation7] sm:$0xff] %v108_v38 }
 0x163   :  { %120 = dma.vmem_to_hbm [thread:$0]  %s116_s24, 128, %s118_s27, [#allocation4]  }
 0x164   :  { %214 = dma.done.wait [#allocation4], 128  }
 0x165   :  { %215 = vsyncadd [#allocation4], 4294967168 }
 0x166   :  { %125 = vsyncpa [#allocation3], 1 }
 0x167   :  { %126 = vsyncpa [#allocation6], 1 }
 0x168   :  { %127 = vsyncpa [#allocation4], 1 }

</bundles_post_ra>
